<compile_context>
chip_gen: v5e
topology: v5e:2x2
jax: 0.10.0
libtpu: 0.0.40
codegen_flags: <defaults>
</compile_context>

<pallas_src>
import numpy as np
import jax
import jax.numpy as jnp
from jax import lax
from jax.experimental import pallas as pl
from jax.experimental.pallas import tpu as pltpu

INP_LEN = 30        # module default
EMB_DIM = 32        # long_term_emb_dim default
C1 = 8              # hidden channels of both CNN encoders
XYWH_FEAT = 4       # features produced by the xywh_rel encoder
VEL_FEAT = 16       # features produced by the velocity encoder
WEIGHT_DTYPE = jnp.bfloat16   # MXU-native; accumulation stays f32


def _round_up(v, m):
    return (v + m - 1) // m * m


# ----------------------------------------------------------------------------
# host-side glue: conv-along-time weight (Cout, Cin, k) -> 2-D block-Toeplitz
# matmul weight (Cout*T_out, Cin*in_stride), batch-on-lanes orientation:
#     y[co*T_out + to, b] = sum_{ci,ti} M[co*T_out+to, ci*in_stride+ti] * x[ci*in_stride+ti, b]
# Columns with ti >= t_in stay zero so sublane-padding rows never contribute.
# ----------------------------------------------------------------------------
def _block_toeplitz_T(w, t_in, pad, in_stride):
    w = np.asarray(w, np.float32)
    cout, cin, k = w.shape
    t_out = t_in + 2 * pad - k + 1
    M = np.zeros((cout, t_out, cin, in_stride), np.float32)
    for to in range(t_out):
        for dk in range(k):
            ti = to + dk - pad
            if 0 <= ti < t_in:
                M[:, to, :, ti] = w[:, :, dk]
    return M.reshape(cout * t_out, cin * in_stride)


# ----------------------------------------------------------------------------
# Pallas kernel: elementwise prep + both CNN encoders + MLP, 5 MXU dots total.
# x_ref block: (4, Tp, bb) f32 with coords (x, y, w, h); batch on lanes.
# ----------------------------------------------------------------------------
def lte_kernel(x_ref, w1_ref, w2_ref, w3_ref, w4_ref, wm_ref,
               b1_ref, b2_ref, b3_ref, b4_ref, bm_ref, out_ref):
    eps = jnp.float32(1e-6)
    x0 = x_ref[0]          # (Tp, bb)
    y0 = x_ref[1]
    wd = x_ref[2]
    ht = x_ref[3]

    # xywh_rel = wh / (xy + eps); padded rows give 0 / (0 + eps) = 0.
    rel = jnp.concatenate([wd / (x0 + eps), ht / (y0 + eps)], axis=0)   # (2*Tp, bb)

    # xyxy positions stacked on sublanes (tile-aligned, stride Tp).  The
    # temporal difference vel[t] = pos[t+1] - pos[t] is folded into w3 on the
    # host, so this stack feeds the velocity encoder directly.
    pos = jnp.concatenate([x0, y0, x0 + wd, y0 + ht], axis=0)           # (4*Tp, bb)

    def layer(w_ref, xin, b_ref):
        z = jnp.dot(w_ref[...], xin.astype(WEIGHT_DTYPE),
                    preferred_element_type=jnp.float32)
        return jnp.maximum(z + b_ref[...], 0.0)

    h_rel = layer(w1_ref, rel, b1_ref)        # (8*T,     bb)
    emb_x = layer(w2_ref, h_rel, b2_ref)      # (4,       bb)
    h_vel = layer(w3_ref, pos, b3_ref)        # (8*(T-1), bb)
    emb_v = layer(w4_ref, h_vel, b4_ref)      # (16,      bb)

    cat = jnp.concatenate([emb_v, emb_x], axis=0)    # (20, bb), offset 16 is tile-aligned
    out_ref[...] = layer(wm_ref, cat, bm_ref)        # (EMB_DIM, bb)


# ----------------------------------------------------------------------------
# wrapper
# ----------------------------------------------------------------------------
def long_term_encoder(in_xywh, p, *, batch_block=128):
    """in_xywh: (inp_len, batch, 4) f32 -> (batch, EMB_DIM) f32."""
    T, B, _ = in_xywh.shape
    Tp = _round_up(T, 8)
    if B > batch_block:
        bb = batch_block
        Bp = _round_up(B, bb)
    else:
        bb, Bp = B, B

    # batch on lanes, time on sublanes, coord as (untiled) leading dim
    x = jnp.transpose(in_xywh.astype(jnp.float32), (2, 0, 1))           # (4, T, B)
    x = jnp.pad(x, ((0, 0), (0, Tp - T), (0, Bp - B)))                  # (4, Tp, Bp)

    weights = (p['w1t'], p['w2t'], p['w3t'], p['w4t'], p['wmt'],
               p['b1c'], p['b2c'], p['b3c'], p['b4c'], p['bmc'])
    full2d = lambda a: pl.BlockSpec(a.shape, lambda i: (0, 0))

    out = pl.pallas_call(
        lte_kernel,
        out_shape=jax.ShapeDtypeStruct((EMB_DIM, Bp), jnp.float32),
        grid=(Bp // bb,),
        in_specs=[pl.BlockSpec((4, Tp, bb), lambda i: (0, 0, i))]
                 + [full2d(a) for a in weights],
        out_specs=pl.BlockSpec((EMB_DIM, bb), lambda i: (0, i)),
        compiler_params=pltpu.CompilerParams(
            dimension_semantics=("parallel",)),
    )(x, *weights)

    return out[:, :B].T                                                 # (B, EMB_DIM)


# ----------------------------------------------------------------------------
# deterministic parameter init (torch-style shapes) + derived kernel weights
# ----------------------------------------------------------------------------
def init_params(key, inp_len=INP_LEN, emb_dim=EMB_DIM):
    ks = jax.random.split(key, 10)
    k2 = inp_len - (XYWH_FEAT - 1)            # -> output width 4
    k4 = (inp_len - 1) - (VEL_FEAT - 1)       # -> output width 16

    def w(k, shape, scale=0.1):
        return scale * jax.random.normal(k, shape, dtype=jnp.float32)

    p = {}
    # conv weights, torch layout (Cout, Cin, kW)
    p['w1'] = w(ks[0], (C1, 2, 3));       p['b1'] = w(ks[1], (C1,))
    p['w2'] = w(ks[2], (1, C1, k2));      p['b2'] = w(ks[3], (1,))
    p['w3'] = w(ks[4], (C1, 4, 3));       p['b3'] = w(ks[5], (C1,))
    p['w4'] = w(ks[6], (1, C1, k4));      p['b4'] = w(ks[7], (1,))
    # encoder_mlp Linear, torch layout (out_features, in_features)
    p['wm'] = w(ks[8], (emb_dim, VEL_FEAT + XYWH_FEAT))
    p['bm'] = w(ks[9], (emb_dim,))

    # ---- kernel-side derived weights: 2-D block-Toeplitz, bf16 ----
    tp = _round_up(inp_len, 8)            # sublane-padded per-channel stride (32)
    tv = inp_len - 1                      # velocity length (29)

    w1t = _block_toeplitz_T(p['w1'], inp_len, pad=1, in_stride=tp)        # (8*T, 2*Tp)
    w2t = _block_toeplitz_T(p['w2'], inp_len, pad=0, in_stride=inp_len)   # (4,   8*T)
    w3v = _block_toeplitz_T(p['w3'], tv,      pad=1, in_stride=tp)        # (8*(T-1), 4*Tp) over vel
    w4t = _block_toeplitz_T(p['w4'], tv,      pad=0, in_stride=tv)        # (16,  8*(T-1))
    # fold the temporal difference vel[t] = pos[t+1] - pos[t] into w3 so the
    # kernel can feed the stacked xyxy positions directly:
    w3d = np.zeros_like(w3v)
    w3d[:, 1:] = w3v[:, :-1]
    w3d -= w3v

    p['w1t'] = jnp.asarray(w1t, WEIGHT_DTYPE)
    p['w2t'] = jnp.asarray(w2t, WEIGHT_DTYPE)
    p['w3t'] = jnp.asarray(w3d, WEIGHT_DTYPE)
    p['w4t'] = jnp.asarray(w4t, WEIGHT_DTYPE)
    p['wmt'] = p['wm'].astype(WEIGHT_DTYPE)                               # (32, 20)

    # biases as (N, 1) f32 columns matching the row layout co*T_out + to
    p['b1c'] = jnp.asarray(np.repeat(np.asarray(p['b1']), inp_len)[:, None], jnp.float32)
    p['b2c'] = jnp.asarray(np.repeat(np.asarray(p['b2']), XYWH_FEAT)[:, None], jnp.float32)
    p['b3c'] = jnp.asarray(np.repeat(np.asarray(p['b3']), tv)[:, None], jnp.float32)
    p['b4c'] = jnp.asarray(np.repeat(np.asarray(p['b4']), VEL_FEAT)[:, None], jnp.float32)
    p['bmc'] = p['bm'][:, None]
    return p


# ----------------------------------------------------------------------------
# pure-JAX reference (mirrors the PyTorch forward, NCHW convs, f32 weights)
# ----------------------------------------------------------------------------
def ref_forward(in_xywh, p):
    T, B, _ = in_xywh.shape
    rel = in_xywh[..., 2:] / (in_xywh[..., :2] + 1e-6)
    rel = jnp.transpose(rel, (2, 1, 0))                      # (2, B, T)
    xyxy = in_xywh.at[..., 2:].add(in_xywh[..., :2])
    vel = jnp.transpose(xyxy[1:] - xyxy[:-1], (2, 1, 0))     # (4, B, T-1)

    def conv(x, w, b, pad):
        y = lax.conv_general_dilated(
            x[None], w[:, :, None, :], window_strides=(1, 1),
            padding=((0, 0), (pad, pad)),
            dimension_numbers=('NCHW', 'OIHW', 'NCHW'))
        return jax.nn.relu(y + b[None, :, None, None])

    hx = conv(rel, p['w1'], p['b1'], 1)
    emb_x = conv(hx[0], p['w2'], p['b2'], 0).reshape(B, -1)   # (B, 4)
    hv = conv(vel, p['w3'], p['b3'], 1)
    emb_v = conv(hv[0], p['w4'], p['b4'], 0).reshape(B, -1)   # (B, 16)
    cat = jnp.concatenate([emb_v, emb_x], axis=-1)
    return jax.nn.relu(cat @ p['wm'].T + p['bm'])


if __name__ == "__main__":
    key = jax.random.PRNGKey(0)
    kx, kp = jax.random.split(key)
    B = 8
    # positive box-like inputs (x, y, w, h) keep wh/(xy+eps) well conditioned
    in_xywh = jax.random.uniform(kx, (INP_LEN, B, 4), dtype=jnp.float32,
                                 minval=0.1, maxval=1.0)
    params = init_params(kp)

    out = jax.block_until_ready(long_term_encoder(in_xywh, params))
    ref = ref_forward(in_xywh, params)

    assert out.shape == (B, EMB_DIM)
    # bf16 matmul weights/operands vs f32 reference -> widened tolerance
    if not np.allclose(np.asarray(out), np.asarray(ref), rtol=6e-2, atol=6e-2):
        raise AssertionError("Pallas kernel output mismatch vs JAX reference")
    print("KERNEL_OK")
</pallas_src>

<mosaic_0001>
module attributes {stable_mosaic.version = 11 : i64} {
  func.func @lte_kernel(%arg0: i32, %arg1: memref<4x32x8xf32, #tpu.memory_space<vmem>>, %arg2: memref<240x64xbf16, #tpu.memory_space<vmem>>, %arg3: memref<4x240xbf16, #tpu.memory_space<vmem>>, %arg4: memref<232x128xbf16, #tpu.memory_space<vmem>>, %arg5: memref<16x232xbf16, #tpu.memory_space<vmem>>, %arg6: memref<32x20xbf16, #tpu.memory_space<vmem>>, %arg7: memref<240x1xf32, #tpu.memory_space<vmem>>, %arg8: memref<4x1xf32, #tpu.memory_space<vmem>>, %arg9: memref<232x1xf32, #tpu.memory_space<vmem>>, %arg10: memref<16x1xf32, #tpu.memory_space<vmem>>, %arg11: memref<32x1xf32, #tpu.memory_space<vmem>>, %arg12: memref<32x8xf32, #tpu.memory_space<vmem>>) attributes {dimension_semantics = [#tpu.dimension_semantics<parallel>], iteration_bounds = array<i64: 1>, scalar_prefetch = 0 : i64, scratch_operands = 0 : i64, tpu.core_type = #tpu.core_type<tc>, window_params = [{transform_indices = @transform_0, window_bounds = array<i64: 4, 32, 8>}, {pipeline_mode = #tpu.pipeline_mode<synchronous>, transform_indices = @transform_1, window_bounds = array<i64: 240, 64>}, {pipeline_mode = #tpu.pipeline_mode<synchronous>, transform_indices = @transform_2, window_bounds = array<i64: 4, 240>}, {pipeline_mode = #tpu.pipeline_mode<synchronous>, transform_indices = @transform_3, window_bounds = array<i64: 232, 128>}, {pipeline_mode = #tpu.pipeline_mode<synchronous>, transform_indices = @transform_4, window_bounds = array<i64: 16, 232>}, {pipeline_mode = #tpu.pipeline_mode<synchronous>, transform_indices = @transform_5, window_bounds = array<i64: 32, 20>}, {pipeline_mode = #tpu.pipeline_mode<synchronous>, transform_indices = @transform_6, window_bounds = array<i64: 240, 1>}, {pipeline_mode = #tpu.pipeline_mode<synchronous>, transform_indices = @transform_7, window_bounds = array<i64: 4, 1>}, {pipeline_mode = #tpu.pipeline_mode<synchronous>, transform_indices = @transform_8, window_bounds = array<i64: 232, 1>}, {pipeline_mode = #tpu.pipeline_mode<synchronous>, transform_indices = @transform_9, window_bounds = array<i64: 16, 1>}, {pipeline_mode = #tpu.pipeline_mode<synchronous>, transform_indices = @transform_10, window_bounds = array<i64: 32, 1>}, {transform_indices = @transform_11, window_bounds = array<i64: 32, 8>}]} {
    %c0 = arith.constant 0 : index
    %c0_0 = arith.constant 0 : index
    %c0_1 = arith.constant 0 : index
    %0 = vector.load %arg1[%c0, %c0_0, %c0_1] : memref<4x32x8xf32, #tpu.memory_space<vmem>>, vector<1x32x8xf32>
    %1 = vector.shape_cast %0 : vector<1x32x8xf32> to vector<32x8xf32>
    %c1 = arith.constant 1 : index
    %c0_2 = arith.constant 0 : index
    %c0_3 = arith.constant 0 : index
    %2 = vector.load %arg1[%c1, %c0_2, %c0_3] : memref<4x32x8xf32, #tpu.memory_space<vmem>>, vector<1x32x8xf32>
    %3 = vector.shape_cast %2 : vector<1x32x8xf32> to vector<32x8xf32>
    %c2 = arith.constant 2 : index
    %c0_4 = arith.constant 0 : index
    %c0_5 = arith.constant 0 : index
    %4 = vector.load %arg1[%c2, %c0_4, %c0_5] : memref<4x32x8xf32, #tpu.memory_space<vmem>>, vector<1x32x8xf32>
    %5 = vector.shape_cast %4 : vector<1x32x8xf32> to vector<32x8xf32>
    %c3 = arith.constant 3 : index
    %c0_6 = arith.constant 0 : index
    %c0_7 = arith.constant 0 : index
    %6 = vector.load %arg1[%c3, %c0_6, %c0_7] : memref<4x32x8xf32, #tpu.memory_space<vmem>>, vector<1x32x8xf32>
    %7 = vector.shape_cast %6 : vector<1x32x8xf32> to vector<32x8xf32>
    %cst = arith.constant 9.99999997E-7 : f32
    %8 = vector.broadcast %cst : f32 to vector<32x8xf32>
    %9 = arith.addf %1, %8 : vector<32x8xf32>
    %10 = arith.divf %5, %9 : vector<32x8xf32>
    %cst_8 = arith.constant 9.99999997E-7 : f32
    %11 = vector.broadcast %cst_8 : f32 to vector<32x8xf32>
    %12 = arith.addf %3, %11 : vector<32x8xf32>
    %13 = arith.divf %7, %12 : vector<32x8xf32>
    %14 = tpu.concatenate %10, %13 in 0 : vector<32x8xf32>, vector<32x8xf32> -> vector<64x8xf32>
    %15 = arith.addf %1, %5 : vector<32x8xf32>
    %16 = arith.addf %3, %7 : vector<32x8xf32>
    %17 = tpu.concatenate %1, %3, %15, %16 in 0 : vector<32x8xf32>, vector<32x8xf32>, vector<32x8xf32>, vector<32x8xf32> -> vector<128x8xf32>
    %c0_9 = arith.constant 0 : index
    %c0_10 = arith.constant 0 : index
    %18 = vector.load %arg2[%c0_9, %c0_10] : memref<240x64xbf16, #tpu.memory_space<vmem>>, vector<240x64xbf16>
    %19 = arith.truncf %14 : vector<64x8xf32> to vector<64x8xbf16>
    %cst_11 = arith.constant dense<0.000000e+00> : vector<240x8xf32>
    %20 = tpu.matmul %18, %19, %cst_11 {dimension_numbers = #tpu.dot_dimension_numbers<[1], [0], [0], [1], [0, 0, 1, 1], [], []>} : vector<240x64xbf16>, vector<64x8xbf16>, vector<240x8xf32> -> vector<240x8xf32>
    %c0_12 = arith.constant 0 : index
    %c0_13 = arith.constant 0 : index
    %21 = vector.load %arg7[%c0_12, %c0_13] : memref<240x1xf32, #tpu.memory_space<vmem>>, vector<240x1xf32>
    %22 = vector.broadcast %21 : vector<240x1xf32> to vector<240x8xf32>
    %23 = arith.addf %20, %22 : vector<240x8xf32>
    %cst_14 = arith.constant 0.000000e+00 : f32
    %24 = vector.broadcast %cst_14 : f32 to vector<240x8xf32>
    %25 = arith.maximumf %23, %24 : vector<240x8xf32>
    %c0_15 = arith.constant 0 : index
    %c0_16 = arith.constant 0 : index
    %26 = vector.load %arg3[%c0_15, %c0_16] : memref<4x240xbf16, #tpu.memory_space<vmem>>, vector<4x240xbf16>
    %27 = arith.truncf %25 : vector<240x8xf32> to vector<240x8xbf16>
    %cst_17 = arith.constant dense<0.000000e+00> : vector<4x8xf32>
    %28 = tpu.matmul %26, %27, %cst_17 {dimension_numbers = #tpu.dot_dimension_numbers<[1], [0], [0], [1], [0, 0, 1, 1], [], []>} : vector<4x240xbf16>, vector<240x8xbf16>, vector<4x8xf32> -> vector<4x8xf32>
    %c0_18 = arith.constant 0 : index
    %c0_19 = arith.constant 0 : index
    %29 = vector.load %arg8[%c0_18, %c0_19] : memref<4x1xf32, #tpu.memory_space<vmem>>, vector<4x1xf32>
    %30 = vector.broadcast %29 : vector<4x1xf32> to vector<4x8xf32>
    %31 = arith.addf %28, %30 : vector<4x8xf32>
    %cst_20 = arith.constant 0.000000e+00 : f32
    %32 = vector.broadcast %cst_20 : f32 to vector<4x8xf32>
    %33 = arith.maximumf %31, %32 : vector<4x8xf32>
    %c0_21 = arith.constant 0 : index
    %c0_22 = arith.constant 0 : index
    %34 = vector.load %arg4[%c0_21, %c0_22] : memref<232x128xbf16, #tpu.memory_space<vmem>>, vector<232x128xbf16>
    %35 = arith.truncf %17 : vector<128x8xf32> to vector<128x8xbf16>
    %cst_23 = arith.constant dense<0.000000e+00> : vector<232x8xf32>
    %36 = tpu.matmul %34, %35, %cst_23 {dimension_numbers = #tpu.dot_dimension_numbers<[1], [0], [0], [1], [0, 0, 1, 1], [], []>} : vector<232x128xbf16>, vector<128x8xbf16>, vector<232x8xf32> -> vector<232x8xf32>
    %c0_24 = arith.constant 0 : index
    %c0_25 = arith.constant 0 : index
    %37 = vector.load %arg9[%c0_24, %c0_25] : memref<232x1xf32, #tpu.memory_space<vmem>>, vector<232x1xf32>
    %38 = vector.broadcast %37 : vector<232x1xf32> to vector<232x8xf32>
    %39 = arith.addf %36, %38 : vector<232x8xf32>
    %cst_26 = arith.constant 0.000000e+00 : f32
    %40 = vector.broadcast %cst_26 : f32 to vector<232x8xf32>
    %41 = arith.maximumf %39, %40 : vector<232x8xf32>
    %c0_27 = arith.constant 0 : index
    %c0_28 = arith.constant 0 : index
    %42 = vector.load %arg5[%c0_27, %c0_28] : memref<16x232xbf16, #tpu.memory_space<vmem>>, vector<16x232xbf16>
    %43 = arith.truncf %41 : vector<232x8xf32> to vector<232x8xbf16>
    %cst_29 = arith.constant dense<0.000000e+00> : vector<16x8xf32>
    %44 = tpu.matmul %42, %43, %cst_29 {dimension_numbers = #tpu.dot_dimension_numbers<[1], [0], [0], [1], [0, 0, 1, 1], [], []>} : vector<16x232xbf16>, vector<232x8xbf16>, vector<16x8xf32> -> vector<16x8xf32>
    %c0_30 = arith.constant 0 : index
    %c0_31 = arith.constant 0 : index
    %45 = vector.load %arg10[%c0_30, %c0_31] : memref<16x1xf32, #tpu.memory_space<vmem>>, vector<16x1xf32>
    %46 = vector.broadcast %45 : vector<16x1xf32> to vector<16x8xf32>
    %47 = arith.addf %44, %46 : vector<16x8xf32>
    %cst_32 = arith.constant 0.000000e+00 : f32
    %48 = vector.broadcast %cst_32 : f32 to vector<16x8xf32>
    %49 = arith.maximumf %47, %48 : vector<16x8xf32>
    %50 = tpu.concatenate %49, %33 in 0 : vector<16x8xf32>, vector<4x8xf32> -> vector<20x8xf32>
    %c0_33 = arith.constant 0 : index
    %c0_34 = arith.constant 0 : index
    %51 = vector.load %arg6[%c0_33, %c0_34] : memref<32x20xbf16, #tpu.memory_space<vmem>>, vector<32x20xbf16>
    %52 = arith.truncf %50 : vector<20x8xf32> to vector<20x8xbf16>
    %cst_35 = arith.constant dense<0.000000e+00> : vector<32x8xf32>
    %53 = tpu.matmul %51, %52, %cst_35 {dimension_numbers = #tpu.dot_dimension_numbers<[1], [0], [0], [1], [0, 0, 1, 1], [], []>} : vector<32x20xbf16>, vector<20x8xbf16>, vector<32x8xf32> -> vector<32x8xf32>
    %c0_36 = arith.constant 0 : index
    %c0_37 = arith.constant 0 : index
    %54 = vector.load %arg11[%c0_36, %c0_37] : memref<32x1xf32, #tpu.memory_space<vmem>>, vector<32x1xf32>
    %55 = vector.broadcast %54 : vector<32x1xf32> to vector<32x8xf32>
    %56 = arith.addf %53, %55 : vector<32x8xf32>
    %cst_38 = arith.constant 0.000000e+00 : f32
    %57 = vector.broadcast %cst_38 : f32 to vector<32x8xf32>
    %58 = arith.maximumf %56, %57 : vector<32x8xf32>
    %c0_39 = arith.constant 0 : index
    %c0_40 = arith.constant 0 : index
    %59 = vector.load %arg12[%c0_39, %c0_40] : memref<32x8xf32, #tpu.memory_space<vmem>>, vector<32x8xf32>
    tpu.vector_store %arg12[%c0_39, %c0_40], %58 {strides = array<i32>} : memref<32x8xf32, #tpu.memory_space<vmem>>, vector<32x8xf32>,
    return
  }
  func.func @transform_0(%arg0: i32) -> (i32, i32, i32) {
    %c0_i32 = arith.constant 0 : i32
    %c0_i32_0 = arith.constant 0 : i32
    %c0_i32_1 = arith.constant 0 : i32
    return %c0_i32, %c0_i32_0, %arg0 : i32, i32, i32
  }
  func.func @transform_1(%arg0: i32) -> (i32, i32) {
    %c0_i32 = arith.constant 0 : i32
    %c0_i32_0 = arith.constant 0 : i32
    %c0_i32_1 = arith.constant 0 : i32
    return %c0_i32, %c0_i32_0 : i32, i32
  }
  func.func @transform_2(%arg0: i32) -> (i32, i32) {
    %c0_i32 = arith.constant 0 : i32
    %c0_i32_0 = arith.constant 0 : i32
    %c0_i32_1 = arith.constant 0 : i32
    return %c0_i32, %c0_i32_0 : i32, i32
  }
  func.func @transform_3(%arg0: i32) -> (i32, i32) {
    %c0_i32 = arith.constant 0 : i32
    %c0_i32_0 = arith.constant 0 : i32
    %c0_i32_1 = arith.constant 0 : i32
    return %c0_i32, %c0_i32_0 : i32, i32
  }
  func.func @transform_4(%arg0: i32) -> (i32, i32) {
    %c0_i32 = arith.constant 0 : i32
    %c0_i32_0 = arith.constant 0 : i32
    %c0_i32_1 = arith.constant 0 : i32
    return %c0_i32, %c0_i32_0 : i32, i32
  }
  func.func @transform_5(%arg0: i32) -> (i32, i32) {
    %c0_i32 = arith.constant 0 : i32
    %c0_i32_0 = arith.constant 0 : i32
    %c0_i32_1 = arith.constant 0 : i32
    return %c0_i32, %c0_i32_0 : i32, i32
  }
  func.func @transform_6(%arg0: i32) -> (i32, i32) {
    %c0_i32 = arith.constant 0 : i32
    %c0_i32_0 = arith.constant 0 : i32
    %c0_i32_1 = arith.constant 0 : i32
    return %c0_i32, %c0_i32_0 : i32, i32
  }
  func.func @transform_7(%arg0: i32) -> (i32, i32) {
    %c0_i32 = arith.constant 0 : i32
    %c0_i32_0 = arith.constant 0 : i32
    %c0_i32_1 = arith.constant 0 : i32
    return %c0_i32, %c0_i32_0 : i32, i32
  }
  func.func @transform_8(%arg0: i32) -> (i32, i32) {
    %c0_i32 = arith.constant 0 : i32
    %c0_i32_0 = arith.constant 0 : i32
    %c0_i32_1 = arith.constant 0 : i32
    return %c0_i32, %c0_i32_0 : i32, i32
  }
  func.func @transform_9(%arg0: i32) -> (i32, i32) {
    %c0_i32 = arith.constant 0 : i32
    %c0_i32_0 = arith.constant 0 : i32
    %c0_i32_1 = arith.constant 0 : i32
    return %c0_i32, %c0_i32_0 : i32, i32
  }
  func.func @transform_10(%arg0: i32) -> (i32, i32) {
    %c0_i32 = arith.constant 0 : i32
    %c0_i32_0 = arith.constant 0 : i32
    %c0_i32_1 = arith.constant 0 : i32
    return %c0_i32, %c0_i32_0 : i32, i32
  }
  func.func @transform_11(%arg0: i32) -> (i32, i32) {
    %c0_i32 = arith.constant 0 : i32
    %c0_i32_0 = arith.constant 0 : i32
    return %c0_i32, %arg0 : i32, i32
  }
}

</mosaic_0001>

<bundles_post_ra>
// kernel: tpu_custom_call.1
= control target key start
LH: loop header
LB: loop body
LE: loop exit
PB: predicated region body
PF: predicated region fallthrough
CT: control target
= control target key end

     0   :  { %v1498_v0 = vmov 0   ;;  %s2414_s6 = inlined_call_operand.vmem [shape: f32[240,1], index: 6, kind: input, shape index: {}]   ;;  %s2415_s0 = inlined_call_operand.vmem [shape: f32[4,32,8], index: 0, kind: input, shape index: {}]   ;;  %s2416_s3 = inlined_call_operand.vmem [shape: bf16[232,128], index: 3, kind: input, shape index: {}]   ;;  %s2417_s1 = inlined_call_operand.vmem [shape: bf16[240,64], index: 1, kind: input, shape index: {}]   ;;  %s2418_s8 = inlined_call_operand.vmem [shape: f32[232,1], index: 8, kind: input, shape index: {}]   ;;  %s2419_s9 = inlined_call_operand.vmem [shape: f32[16,1], index: 9, kind: input, shape index: {}]   ;;  %s2420_s7 = inlined_call_operand.vmem [shape: f32[4,1], index: 7, kind: input, shape index: {}]   ;;  %s2421_s10 = inlined_call_operand.vmem [shape: f32[32,1], index: 10, kind: input, shape index: {}]   ;;  %s2422_s2 = inlined_call_operand.vmem [shape: bf16[4,240], index: 2, kind: input, shape index: {}]   ;;  %s2423_s4 = inlined_call_operand.vmem [shape: bf16[16,232], index: 4, kind: input, shape index: {}]   ;;  %s2424_s5 = inlined_call_operand.vmem [shape: bf16[32,20], index: 5, kind: input, shape index: {}]   ;;  %s2425_s11 = inlined_call_operand.vmem [shape: f32[32,8], index: 11, kind: output, shape index: {}]  }
   0x1   :  { %1481 = vset.pattern.permute.xlu2 %v1498_v0  ;;  %1479 = vset.pattern.permute.xlu0 %v1498_v0  ;;  %v256_v1 = vld [vmem:[%s2414_s6 + $0xe0] sm:$0xff]  ;;  %v254_v3 = vld [vmem:[%s2414_s6 + $0xd0] sm:$0xff]  ;;  %v1273_v5 = vld [vmem:[%s2415_s0 + $0x38] sm:$0xff] }
   0x2   :  { %v252_v2 = vld [vmem:[%s2414_s6 + $0xc0] sm:$0xff]  ;;  %1480 = vset.pattern.permute.xlu1 %v1498_v0  ;;  %400 = vperm.xlu0 %1479, %v256_v1   ;;  %v1272_v4 = vld [vmem:[%s2415_s0 + $0x30] sm:$0xff]  ;;  %v1582_v7 = vld [vmem:[%s2415_s0 + $0x78] sm:$0xff]  ;;  %v1586_v9 = vadd.f32 1e-06, %v1273_v5 }
   0x3   :  { %v1577_v6 = vld [vmem:[%s2415_s0 + $0x70] sm:$0xff]  ;;  %380 = vperm.xlu2 %1481, %v252_v2   ;;  %390 = vperm.xlu1 %1480, %v254_v3   ;;  %v1584_v8 = vadd.f32 1e-06, %v1272_v4  ;;  %v193_v11 = vadd.f32 %v1582_v7, %v1273_v5  ;;  %v1270_v12 = vld [vmem:[%s2415_s0 + $0x20] sm:$0xff]  ;;  %v1271_v13 = vld [vmem:[%s2415_s0 + $0x28] sm:$0xff]  ;;  %v1611_v18 = vpack.c.bf16 %v1273_v5, %v1272_v4 }
   0x4   :  { %v192_v10 = vadd.f32 %v1577_v6, %v1272_v4  ;;  %v1600_v14 = vld [vmem:[%s2415_s0 + $0x60] sm:$0xff]  ;;  %v1605_v15 = vld [vmem:[%s2415_s0 + $0x68] sm:$0xff]  ;;  %v1607_v16 = vadd.f32 1e-06, %v1270_v12  ;;  %v1609_v17 = vadd.f32 1e-06, %v1271_v13  ;;  %vm176_vm1 = vweird.f32 %v1586_v9 }
   0x5   :  { %1482 = vrcp.f32 %v1584_v8  ;;  %v257_v20 = vld [vmem:[%s2414_s6 + $0xe8] sm:$0xff]  ;;  %v190_v21 = vadd.f32 %v1600_v14, %v1270_v12  ;;  %v191_v22 = vadd.f32 %v1605_v15, %v1271_v13  ;;  %v1624_v23 = vld [vmem:[%s2415_s0 + $0x10] sm:$0xff]  ;;  %v1629_v24 = vld [vmem:[%s2415_s0 + $0x18] sm:$0xff]  ;;  %vm161_vm0 = vweird.f32 %v1584_v8 }
   0x6   :  { %1484 = vrcp.f32 %v1586_v9  ;;  %v1614_v19 = vpack.c.bf16 %v193_v11, %v192_v10  ;;  %v1635_v25 = vld [vmem:[%s2415_s0 + $0x50] sm:$0xff]  ;;  %v1640_v26 = vld [vmem:[%s2415_s0 + $0x58] sm:$0xff]  ;;  %v1643_v27 = vadd.f32 1e-06, %v1624_v23  ;;  %v1646_v28 = vadd.f32 1e-06, %v1629_v24 }
   0x7   :  { %1486 = vrcp.f32 %v1607_v16  ;;  %v253_v29 = vld [vmem:[%s2414_s6 + $0xc8] sm:$0xff]  ;;  %v1654_v30 = vpack.c.bf16 %v191_v22, %v190_v21  ;;  %v255_v31 = vld [vmem:[%s2414_s6 + $0xd8] sm:$0xff]  ;;  %v188_v32 = vadd.f32 %v1635_v25, %v1624_v23  ;;  %v189_v33 = vadd.f32 %v1640_v26, %v1629_v24  ;;  %v1666_v34 = vld [vmem:[%s2415_s0] sm:$0xff] }
   0x8   :  { %1470 = vmatpush.bf16.msra.mxu3 %v1614_v19  ;;  %1488 = vrcp.f32 %v1609_v17  ;;  %v1672_v35 = vld [vmem:[%s2415_s0 + $0x8] sm:$0xff]  ;;  %v1677_v36 = vld [vmem:[%s2415_s0 + $0x40] sm:$0xff]  ;;  %v1685_v38 = vadd.f32 1e-06, %v1666_v34  ;;  %v167_v39 = vand.u32 2147483648, %v1584_v8  ;;  %v1695_v42 = vpack.c.bf16 %v1271_v13, %v1270_v12  ;;  %v250_v60 = vld [vmem:[%s2414_s6 + $0xb0] sm:$0xff] }
   0x9   :  { %1490 = vrcp.f32 %v1643_v27  ;;  %v1682_v37 = vld [vmem:[%s2415_s0 + $0x48] sm:$0xff]  ;;  %v1691_v40 = vadd.f32 1e-06, %v1672_v35  ;;  %v186_v41 = vadd.f32 %v1677_v36, %v1666_v34  ;;  %v1699_v44 = vpack.c.bf16 %v189_v33, %v188_v32  ;;  %v248_v0 = vld [vmem:[%s2414_s6 + $0xa0] sm:$0xff]  ;;  %v251_v1 = vld [vmem:[%s2414_s6 + $0xb8] sm:$0xff] }
   0xa   :  { %405 = vperm.xlu0 %1479, %v257_v20   ;;  %1492 = vrcp.f32 %v1646_v28  ;;  %v187_v45 = vadd.f32 %v1682_v37, %v1672_v35  ;;  %v165_v46 = vand.u32 2147483647, %v1584_v8  ;;  %v168_v49 = vor.u32 1.1754944e-38, %v167_v39  ;;  %v1454_v11 = vld [vmem:[%s2416_s3 + $0x30] sm:$0xff] }
   0xb   :  { %v1697_v43 = vpop.eup %1482  ;;  %385 = vperm.xlu2 %1481, %v253_v29   ;;  %395 = vperm.xlu1 %1480, %v255_v31   ;;  %1494 = vrcp.f32 %v1685_v38  ;;  %v180_v50 = vand.u32 2147483647, %v1586_v9  ;;  %v182_v57 = vand.u32 2147483648, %v1586_v9  ;;  %vm131_vm6 = vweird.f32 %v1607_v16 }
   0xc   :  { %v1485_v47 = vpop.eup %1484  ;;  %1471 = vmatpush.bf16.msra.mxu3 %v1654_v30  ;;  %1496 = vrcp.f32 %v1691_v40  ;;  %v157_v48 = vmul.f32 %v1697_v43, %v1584_v8  ;;  %v1710_v52 = vpack.c.bf16 %v187_v45, %v186_v41  ;;  %vm162_vm2 = vweird.f32 %v1697_v43 }
   0xd   :  { %v1487_v51 = vpop.eup %1486  ;;  %vm1713_vm3 = vcmp.eq.f32.partialorder %v165_v46, 8.507059e+37  ;;  %v172_v54 = vmul.f32 %v1485_v47, %v1586_v9  ;;  %vm177_vm4 = vweird.f32 %v1485_v47  ;;  %vm1727_vm5 = vcmp.eq.f32.partialorder %v180_v50, 8.507059e+37  ;;  %vm1750_vm8 = vmor %vm161_vm0, %vm162_vm2 }
   0xe   :  { %v1718_v55 = vpop.eup %1488  ;;  %v158_v56 = vsub.f32 1.0, %v157_v48  ;;  %v127_v58 = vmul.f32 %v1487_v51, %v1607_v16  ;;  %vm132_vm7 = vweird.f32 %v1487_v51  ;;  %v135_v4 = vand.u32 2147483647, %v1607_v16  ;;  %vm1763_vm10 = vmor %vm176_vm1, %vm177_vm4 }
   0xf   :  { %v1722_v59 = vpop.eup %1490  ;;  %v173_v61 = vsub.f32 1.0, %v172_v54  ;;  %v137_v5 = vand.u32 2147483648, %v1607_v16  ;;  %v183_v13 = vor.u32 1.1754944e-38, %v182_v57  ;;  %v142_v20 = vmul.f32 %v1718_v55, %v1609_v17  ;;  %vm1771_vm12 = vmor %vm131_vm6, %vm132_vm7 }
  0x10   :  { %v1732_v63 = vpop.eup %1492  ;;  %1472 = vmatpush.bf16.msra.mxu3 %v1699_v44  ;;  %v159_v2 = vmul.f32 %v1697_v43, %v158_v56  ;;  %v128_v3 = vsub.f32 1.0, %v127_v58  ;;  %vm146_vm9 = vweird.f32 %v1609_v17  ;;  %vm147_vm11 = vweird.f32 %v1718_v55  ;;  %v245_v56 = vld [vmem:[%s2414_s6 + $0x88] sm:$0xff] }
  0x11   :  { %v1744_v10 = vpop.eup %1494  ;;  %v174_v12 = vmul.f32 %v1485_v47, %v173_v61  ;;  %v138_v31 = vor.u32 1.1754944e-38, %v137_v5  ;;  %v143_v39 = vsub.f32 1.0, %v142_v20  ;;  %v150_v9 = vand.u32 2147483647, %v1609_v17  ;;  %vm1801_vm15 = vmor %vm146_vm9, %vm147_vm11 }
  0x12   :  { %v1757_v21 = vpop.eup %1496  ;;  %370 = vperm.xlu0 %1479, %v250_v60   ;;  %v160_v22 = vadd.f32 %v1697_v43, %v159_v2  ;;  %v129_v29 = vmul.f32 %v1487_v51, %v128_v3  ;;  %v152_v41 = vand.u32 2147483648, %v1609_v17  ;;  %vm136_vm13 = vcmp.eq.f32.partialorder %v135_v4, 8.507059e+37 }
  0x13   :  { %360 = vperm.xlu2 %1481, %v248_v0   ;;  %375 = vperm.xlu1 %1480, %v251_v1   ;;  %v175_v32 = vadd.f32 %v1485_v47, %v174_v12  ;;  %v93_v16 = vmul.f32 %v1722_v59, %v1643_v27  ;;  %v144_v54 = vmul.f32 %v1718_v55, %v143_v39  ;;  %vm1788_vm14 = vcmp.eq.f32.partialorder %v150_v9, 8.507059e+37  ;;  %v1445_v39 = vld [vmem:[%s2417_s1 + $0x60] sm:$0xff] }
  0x14   :  { %1473 = vmatpush.bf16.msra.mxu3 %v1710_v52  ;;  %v164_v45 = vsel %vm1750_vm8, %v1697_v43, %v160_v22  ;;  %v130_v46 = vadd.f32 %v1487_v51, %v129_v29  ;;  %vm97_vm0 = vweird.f32 %v1643_v27  ;;  %vm98_vm1 = vweird.f32 %v1722_v59 }
  0x15   :  { %v169_v48 = vsel %vm1713_vm3, %v168_v49, %v164_v45  ;;  %v179_v50 = vsel %vm1763_vm10, %v1485_v47, %v175_v32  ;;  %v153_v49 = vor.u32 1.1754944e-38, %v152_v41  ;;  %v145_v61 = vadd.f32 %v1718_v55, %v144_v54  ;;  %vm1832_vm2 = vmor %vm97_vm0, %vm98_vm1 }
  0x16   :  { %v170_v57 = vmul.f32 %v1577_v6, %v169_v48  ;;  %v184_v43 = vsel %vm1727_vm5, %v183_v13, %v179_v50  ;;  %v134_v58 = vsel %vm1771_vm12, %v1487_v51, %v130_v46  ;;  %v249_v6 = vld [vmem:[%s2414_s6 + $0xa8] sm:$0xff]  ;;  %v94_v62 = vsub.f32 1.0, %v93_v16  ;;  %v242_v48 = vld [vmem:[%s2414_s6 + $0x70] sm:$0xff] }
  0x17   :  { %v185_v53 = vmul.f32 %v1582_v7, %v184_v43  ;;  %v139_v60 = vsel %vm136_vm13, %v138_v31, %v134_v58  ;;  %v101_v17 = vand.u32 2147483647, %v1643_v27  ;;  %v247_v7 = vld [vmem:[%s2414_s6 + $0x98] sm:$0xff]  ;;  %v149_v1 = vsel %vm1801_vm15, %v1718_v55, %v145_v61 }
  0x18   :  { %1474 = vmatpush.bf16.msra.mxu3 %v1611_v18  ;;  %v140_v51 = vmul.f32 %v1600_v14, %v139_v60  ;;  %v95_v2 = vmul.f32 %v1722_v59, %v94_v62  ;;  %v103_v3 = vand.u32 2147483648, %v1643_v27  ;;  %v246_v14 = vld [vmem:[%s2414_s6 + $0x90] sm:$0xff]  ;;  %v154_v4 = vsel %vm1788_vm14, %v153_v49, %v149_v1  ;;  %v752_v55 = vld [vmem:[%s2418_s8 + $0x78] sm:$0xff] }
  0x19   :  { %v227_v0 = vpack.c.bf16 %v185_v53, %v170_v57  ;;  %v1830_v5 = vpack.c.bf16 %v1629_v24, %v1624_v23  ;;  %vm1836_vm3 = vcmp.eq.f32.partialorder %v101_v17, 8.507059e+37  ;;  %v108_v27 = vmul.f32 %v1732_v63, %v1646_v28  ;;  %v1453_v53 = vld [vmem:[%s2416_s3 + $0x28] sm:$0xff]  ;;  %v243_v17 = vld [vmem:[%s2414_s6 + $0x78] sm:$0xff] }
  0x1a   :  { %365 = vperm.xlu0 %1479, %v249_v6   ;;  %v155_v12 = vmul.f32 %v1605_v15, %v154_v4  ;;  %v96_v13 = vadd.f32 %v1722_v59, %v95_v2  ;;  %v104_v20 = vor.u32 1.1754944e-38, %v103_v3  ;;  %vm112_vm4 = vweird.f32 %v1646_v28  ;;  %v240_v2 = vld [vmem:[%s2414_s6 + $0x60] sm:$0xff]  ;;  %v239_v4 = vld [vmem:[%s2414_s6 + $0x58] sm:$0xff] }
  0x1b   :  { %533 = vmatpush.bf16.msra.mxu0 %v227_v0  ;;  %1466 = vmatpush.bf16.msra.mxu1 %v227_v0  ;;  %v109_v23 = vsub.f32 1.0, %v108_v27  ;;  %vm113_vm5 = vweird.f32 %v1732_v63  ;;  %v116_v24 = vand.u32 2147483647, %v1646_v28  ;;  %v118_v22 = vand.u32 2147483648, %v1646_v28  ;;  %v237_v27 = vld [vmem:[%s2414_s6 + $0x48] sm:$0xff] }
  0x1c   :  { %355 = vperm.xlu2 %1481, %v247_v7   ;;  %1475 = vmatpush.bf16.msra.mxu3 %v1695_v42  ;;  %v226_v8 = vpack.c.bf16 %v155_v12, %v140_v51  ;;  %v100_v15 = vsel %vm1832_vm2, %v1722_v59, %v96_v13  ;;  %v1854_v29 = vpack.c.bf16 %v1672_v35, %v1666_v34  ;;  %vm67_vm7 = vweird.f32 %v1685_v38  ;;  %vm1868_vm8 = vmor %vm112_vm4, %vm113_vm5  ;;  %v244_v59 = vld [vmem:[%s2414_s6 + $0x80] sm:$0xff]  ;;  %v1434_v13 = vld [vmem:[%s2417_s1 + $0x8] sm:$0xff] }
  0x1d   :  { %350 = vperm.xlu1 %1480, %v246_v14   ;;  %v63_v31 = vmul.f32 %v1744_v10, %v1685_v38  ;;  %v105_v32 = vsel %vm1836_vm3, %v104_v20, %v100_v15  ;;  %v110_v33 = vmul.f32 %v1732_v63, %v109_v23  ;;  %vm1861_vm6 = vcmp.eq.f32.partialorder %v116_v24, 8.507059e+37  ;;  %v751_v14 = vld [vmem:[%s2418_s8 + $0x70] sm:$0xff]  ;;  %v236_v12 = vld [vmem:[%s2414_s6 + $0x40] sm:$0xff]  ;;  %v1444_v20 = vld [vmem:[%s2417_s1 + $0x58] sm:$0xff] }
  0x1e   :  { %2445 = vst [vmem:[#allocation2_spill] sm:$0xff] %v1854_v29  ;;  %v119_v35 = vor.u32 1.1754944e-38, %v118_v22  ;;  %vm68_vm9 = vweird.f32 %v1744_v10  ;;  %v71_v41 = vand.u32 2147483647, %v1685_v38  ;;  %v106_v45 = vmul.f32 %v1635_v25, %v105_v32  ;;  %v749_v23 = vld [vmem:[%s2418_s8 + $0x60] sm:$0xff]  ;;  %v234_v24 = vld [vmem:[%s2414_s6 + $0x30] sm:$0xff] }
  0x1f   :  { %534 = vmatpush.bf16.msra.mxu0 %v226_v8  ;;  %1467 = vmatpush.bf16.msra.mxu1 %v226_v8  ;;  %v64_v9 = vsub.f32 1.0, %v63_v31  ;;  %v111_v28 = vadd.f32 %v1732_v63, %v110_v33  ;;  %v73_v46 = vand.u32 2147483648, %v1685_v38  ;;  %v78_v16 = vmul.f32 %v1757_v21, %v1691_v40  ;;  %vm1900_vm12 = vmor %vm67_vm7, %vm68_vm9  ;;  %v750_v22 = vld [vmem:[%s2418_s8 + $0x68] sm:$0xff]  ;;  %v1455_v8 = vld [vmem:[%s2416_s3 + $0x38] sm:$0xff] }
  0x20   :  { %1476 = vmatpush.bf16.msra.mxu3 %v1830_v5  ;;  %vm82_vm10 = vweird.f32 %v1691_v40  ;;  %vm83_vm11 = vweird.f32 %v1757_v21  ;;  %v86_v54 = vand.u32 2147483647, %v1691_v40  ;;  %v88_v47 = vand.u32 2147483648, %v1691_v40  ;;  %v241_v40 = vld [vmem:[%s2414_s6 + $0x68] sm:$0xff]  ;;  %v235_v15 = vld [vmem:[%s2414_s6 + $0x38] sm:$0xff]  ;;  %v747_v32 = vld [vmem:[%s2418_s8 + $0x50] sm:$0xff] }
  0x21   :  { %v65_v50 = vmul.f32 %v1744_v10, %v64_v9  ;;  %v115_v25 = vsel %vm1868_vm8, %v1732_v63, %v111_v28  ;;  %v74_v43 = vor.u32 1.1754944e-38, %v73_v46  ;;  %v79_v58 = vsub.f32 1.0, %v78_v16  ;;  %vm84_vm14 = vmor %vm82_vm10, %vm83_vm11  ;;  %v748_v31 = vld [vmem:[%s2418_s8 + $0x58] sm:$0xff]  ;;  %v1435_v33 = vld [vmem:[%s2417_s1 + $0x10] sm:$0xff] }
  0x22   :  { %340 = vperm.xlu0 %1479, %v244_v59   ;;  %v120_v63 = vsel %vm1861_vm6, %v119_v35, %v115_v25  ;;  %vm72_vm13 = vcmp.eq.f32.partialorder %v71_v41, 8.507059e+37  ;;  %v89_v61 = vor.u32 1.1754944e-38, %v88_v47  ;;  %vm87_vm15 = vcmp.eq.f32.partialorder %v86_v54, 8.507059e+37  ;;  %v765_v34 = vld [vmem:[%s2418_s8 + $0xe0] sm:$0xff]  ;;  %v233_v35 = vld [vmem:[%s2414_s6 + $0x28] sm:$0xff]  ;;  %v1436_v46 = vld [vmem:[%s2417_s1 + $0x18] sm:$0xff] }
  0x23   :  { %v66_v49 = vadd.f32 %v1744_v10, %v65_v50  ;;  %v121_v38 = vmul.f32 %v1640_v26, %v120_v63  ;;  %v80_v6 = vmul.f32 %v1757_v21, %v79_v58  ;;  %vm483_vm0 = vcmask 523264   ;;  %v232_v59 = vld [vmem:[%s2414_s6 + $0x20] sm:$0xff]  ;;  %v746_v28 = vld [vmem:[%s2418_s8 + $0x48] sm:$0xff]  ;;  %v231_v50 = vld [vmem:[%s2414_s6 + $0x18] sm:$0xff] }
  0x24   :  { %330 = vperm.xlu2 %1481, %v242_v48   ;;  %1477 = vmatpush.bf16.msra.mxu3 %v1854_v29  ;;  %v1456_v9 = vld [vmem:[%s2416_s3 + $0x40] sm:$0xff]  ;;  %v1446_v16 = vld [vmem:[%s2417_s1 + $0x68] sm:$0xff]  ;;  %v744_v54 = vld [vmem:[%s2418_s8 + $0x38] sm:$0xff]  ;;  %vm1153_vm1 = vcmask 1043456   ;;  %vm670_vm2 = vcmask 916480   ;;  %vm1234_vm3 = vcmask 1041408  }
  0x25   :  { %345 = vperm.xlu1 %1480, %v245_v56   ;;  %v70_v60 = vsel %vm1900_vm12, %v1744_v10, %v66_v49  ;;  %v225_v62 = vpack.c.bf16 %v121_v38, %v106_v45  ;;  %v81_v26 = vadd.f32 %v1757_v21, %v80_v6  ;;  %v745_v41 = vld [vmem:[%s2418_s8 + $0x40] sm:$0xff]  ;;  %v230_v45 = vld [vmem:[%s2414_s6 + $0x10] sm:$0xff]  ;;  %v1457_v56 = vld [vmem:[%s2416_s3 + $0x48] sm:$0xff]  ;;  %vm1149_vm4 = vcmask 850944  }
  0x26   :  { %v75_v51 = vsel %vm72_vm13, %v74_v43, %v70_v60  ;;  %v743_v25 = vld [vmem:[%s2418_s8 + $0x30] sm:$0xff]  ;;  %v228_v58 = vld [vmem:[%s2414_s6] sm:$0xff]  ;;  %v764_v47 = vld [vmem:[%s2418_s8 + $0xd8] sm:$0xff]  ;;  %vm1227_vm5 = vcmask 162816   ;;  %vm1261_vm6 = vcmask 64512  }
  0x27   :  { %1032 = vmatmul.bf16.vlgmr.msra.gmra.mxu3 %v1453_v53  ;;  %535 = vmatpush.bf16.msra.mxu0 %v225_v62  ;;  %v76_v10 = vmul.f32 %v1677_v36, %v75_v51  ;;  %v85_v0 = vsel %vm84_vm14, %v1757_v21, %v81_v26  ;;  %v1433_v36 = vld [vmem:[%s2417_s1] sm:$0xff]  ;;  %v1443_v21 = vld [vmem:[%s2417_s1 + $0x50] sm:$0xff]  ;;  %v229_v38 = vld [vmem:[%s2414_s6 + $0x8] sm:$0xff] }
  0x28   :  { %1468 = vmatpush.bf16.msra.mxu1 %v225_v62  ;;  %v90_v7 = vsel %vm87_vm15, %v89_v61, %v85_v0  ;;  %v763_v43 = vld [vmem:[%s2418_s8 + $0xd0] sm:$0xff]  ;;  %v1437_v63 = vld [vmem:[%s2417_s1 + $0x20] sm:$0xff]  ;;  %v742_v6 = vld [vmem:[%s2418_s8 + $0x28] sm:$0xff] }
  0x29   :  { %v91_v1 = vmul.f32 %v1682_v37, %v90_v7  ;;  %v238_v37 = vld [vmem:[%s2414_s6 + $0x50] sm:$0xff]  ;;  %v741_v60 = vld [vmem:[%s2418_s8 + $0x20] sm:$0xff]  ;;  %v1438_v7 = vld [vmem:[%s2417_s1 + $0x28] sm:$0xff] }
  0x2a   :  { %335 = vperm.xlu0 %1479, %v243_v17   ;;  %v1447_v49 = vld [vmem:[%s2417_s1 + $0x70] sm:$0xff]  ;;  %v761_v17 = vld [vmem:[%s2418_s8 + $0xc0] sm:$0xff] }
  0x2b   :  { %v224_v3 = vpack.c.bf16 %v91_v1, %v76_v10  ;;  %v1458_v61 = vld [vmem:[%s2416_s3 + $0x50] sm:$0xff]  ;;  %v762_v10 = vld [vmem:[%s2418_s8 + $0xc8] sm:$0xff] }
  0x2c   :  { %325 = vperm.xlu2 %1481, %v241_v40  }
  0x2d   :  { %320 = vperm.xlu1 %1480, %v240_v2   ;;  %536 = vmatpush.bf16.msra.mxu0 %v224_v3  ;;  %v740_v2 = vld [vmem:[%s2418_s8 + $0x18] sm:$0xff] }
  0x2e   :  { %1469 = vmatpush.bf16.msra.mxu1 %v224_v3  ;;  %v739_v3 = vld [vmem:[%s2418_s8 + $0x10] sm:$0xff] }
  0x30   :  { %1342 = vmatmul.msk.bf16.vlgmr.msra.gmra.mxu0 %vm483_vm0, %v1433_v36  ;;  %v759_v36 = vld [vmem:[%s2418_s8 + $0xb0] sm:$0xff] }
  0x31   :  { %1352 = vmatmul.msk.bf16.vlgmr.msra.gmra.mxu1 %vm483_vm0, %v1443_v21  ;;  %v1459_v21 = vld [vmem:[%s2416_s3 + $0x58] sm:$0xff] }
  0x32   :  { %310 = vperm.xlu0 %1479, %v238_v37  }
  0x34   :  { %838 = vperm.xlu2 %1481, %v751_v14  }
  0x35   :  { %315 = vperm.xlu1 %1480, %v239_v4  }
  0x37   :  { %1037 = vmatmul.bf16.gmra.mxu3 %v1454_v11  ;;  %v737_v11 = vld [vmem:[%s2418_s8] sm:$0xff] }
  0x3a   :  { %843 = vperm.xlu0 %1479, %v752_v55   ;;  %v760_v55 = vld [vmem:[%s2418_s8 + $0xb8] sm:$0xff] }
  0x3c   :  { %305 = vperm.xlu2 %1481, %v237_v27   ;;  %v738_v27 = vld [vmem:[%s2418_s8 + $0x8] sm:$0xff] }
  0x3d   :  { %300 = vperm.xlu1 %1480, %v236_v12  }
  0x40   :  { %1343 = vmatmul.msk.bf16.gmra.mxu0 %vm483_vm0, %v1434_v13  ;;  %v1439_v13 = vld [vmem:[%s2417_s1 + $0x30] sm:$0xff] }
  0x41   :  { %1353 = vmatmul.msk.bf16.gmra.mxu1 %vm483_vm0, %v1444_v20 }
  0x42   :  { %828 = vperm.xlu0 %1479, %v749_v23  }
  0x44   :  { %290 = vperm.xlu2 %1481, %v234_v24   ;;  %v758_v24 = vld [vmem:[%s2418_s8 + $0xa8] sm:$0xff] }
  0x45   :  { %833 = vperm.xlu1 %1480, %v750_v22   ;;  %v757_v22 = vld [vmem:[%s2418_s8 + $0xa0] sm:$0xff] }
  0x47   :  { %1042 = vmatmul.bf16.gmra.mxu3 %v1455_v8  ;;  %v755_v8 = vld [vmem:[%s2418_s8 + $0x90] sm:$0xff] }
  0x4a   :  { %295 = vperm.xlu0 %1479, %v235_v15   ;;  %v1460_v15 = vld [vmem:[%s2416_s3 + $0x60] sm:$0xff] }
  0x4c   :  { %823 = vperm.xlu2 %1481, %v748_v31  }
  0x4d   :  { %818 = vperm.xlu1 %1480, %v747_v32  }
  0x50   :  { %1344 = vmatmul.msk.bf16.gmra.mxu0 %vm483_vm0, %v1435_v33 }
  0x51   :  { %1354 = vmatmul.msk.bf16.gmra.mxu1 %vm483_vm0, %v1445_v39  ;;  %v753_v39 = vld [vmem:[%s2418_s8 + $0x80] sm:$0xff] }
  0x52   :  { %908 = vperm.xlu0 %1479, %v765_v34   ;;  %v756_v34 = vld [vmem:[%s2418_s8 + $0x98] sm:$0xff] }
  0x54   :  { %285 = vperm.xlu2 %1481, %v233_v35   ;;  %v754_v35 = vld [vmem:[%s2418_s8 + $0x88] sm:$0xff] }
  0x55   :  { %280 = vperm.xlu1 %1480, %v232_v59  }
  0x57   :  { %1047 = vmatmul.bf16.gmra.mxu3 %v1456_v9  ;;  %v1440_v9 = vld [vmem:[%s2417_s1 + $0x38] sm:$0xff] }
  0x5a   :  { %808 = vperm.xlu0 %1479, %v745_v41  }
  0x5c   :  { %270 = vperm.xlu2 %1481, %v230_v45   ;;  %v1128_v45 = vld [vmem:[%s2419_s9] sm:$0xff] }
  0x5d   :  { %v2027_v48 = vpop.permute.xlu2 %380  ;;  %813 = vperm.xlu1 %1480, %v746_v28  }
  0x60   :  { %1345 = vmatmul.msk.bf16.gmra.mxu0 %vm483_vm0, %v1436_v46  ;;  %v659_v46 = vld [vmem:[%s2420_s7] sm:$0xf] }
  0x61   :  { %1355 = vmatmul.msk.bf16.gmra.mxu1 %vm483_vm0, %v1446_v16  ;;  %v1129_v16 = vld [vmem:[%s2419_s9 + $0x8] sm:$0xff] }
  0x62   :  { %275 = vperm.xlu0 %1479, %v231_v50   ;;  %v1461_v50 = vld [vmem:[%s2416_s3 + $0x68] sm:$0xff] }
  0x64   :  { %803 = vperm.xlu2 %1481, %v744_v54  }
  0x65   :  { %v2043_v57 = vpop.permute.xlu2 %385  ;;  %798 = vperm.xlu1 %1480, %v743_v25  }
  0x67   :  { %1052 = vmatmul.bf16.gmra.mxu3 %v1457_v56  ;;  %v1194_v56 = vld [vmem:[%s2421_s10 + $0x8] sm:$0xff] }
  0x6a   :  { %898 = vperm.xlu0 %1479, %v763_v43   ;;  %v1193_v43 = vld [vmem:[%s2421_s10] sm:$0xff] }
  0x6c   :  { %260 = vperm.xlu2 %1481, %v228_v58  }
  0x6d   :  { %v2060_v53 = vpop.permute.xlu2 %360  ;;  %903 = vperm.xlu1 %1480, %v764_v47   ;;  %v1195_v47 = vld [vmem:[%s2421_s10 + $0x10] sm:$0xff] }
  0x70   :  { %1346 = vmatmul.msk.bf16.gmra.mxu0 %vm483_vm0, %v1437_v63 }
  0x71   :  { %1356 = vmatmul.msk.bf16.gmra.mxu1 %vm483_vm0, %v1447_v49 }
  0x72   :  { %265 = vperm.xlu0 %1479, %v229_v38   ;;  %v728_v38 = vld [vmem:[%s2416_s3 + $0x70] sm:$0xf] }
  0x74   :  { %v2076_v62 = vpop.permute.xlu0 %400  ;;  %793 = vperm.xlu2 %1481, %v742_v6   ;;  %v1441_v6 = vld [vmem:[%s2417_s1 + $0x40] sm:$0xff] }
  0x75   :  { %v2078_v51 = vpop.permute.xlu1 %390  ;;  %788 = vperm.xlu1 %1480, %v741_v60  }
  0x76   :  { %v2080_v26 = vpop.permute.xlu2 %355 }
  0x77   :  { %1057 = vmatmul.bf16.gmra.mxu3 %v1458_v61 }
  0x7a   :  { %888 = vperm.xlu0 %1479, %v761_v17  }
  0x7c   :  { %v2088_v0 = vpop.permute.xlu0 %405  ;;  %778 = vperm.xlu2 %1481, %v739_v3  }
  0x7d   :  { %v2093_v40 = vpop.permute.xlu1 %395  ;;  %893 = vperm.xlu1 %1480, %v762_v10   ;;  %v968_v10 = vunpack.c.l.b16 %v728_v38 }
  0x7e   :  { %v2095_v1 = vpop.permute.xlu2 %330 }
  0x80   :  { %1347 = vmatmul.msk.bf16.gmra.mxu0 %vm483_vm0, %v1438_v7  ;;  %v1196_v7 = vld [vmem:[%s2421_s10 + $0x18] sm:$0xff] }
  0x82   :  { %783 = vperm.xlu0 %1479, %v740_v2  }
  0x84   :  { %v2110_v37 = vpop.permute.xlu0 %370  ;;  %883 = vperm.xlu2 %1481, %v760_v55  }
  0x85   :  { %v2112_v14 = vpop.permute.xlu1 %375  ;;  %878 = vperm.xlu1 %1480, %v759_v36   ;;  %v983_v36 = vpack.c.b16 %v968_v10, %v968_v10 }
  0x86   :  { %v2114_v4 = vpop.permute.xlu2 %325 }
  0x87   :  { %1062 = vmatmul.bf16.gmra.mxu3 %v1459_v21 }
  0x8a   :  { %768 = vperm.xlu0 %1479, %v737_v11  }
  0x8c   :  { %v2125_v12 = vpop.permute.xlu0 %365  ;;  %868 = vperm.xlu2 %1481, %v757_v22  }
  0x8d   :  { %773 = vperm.xlu1 %1480, %v738_v27  }
  0x8e   :  { %v2130_v20 = vpop.permute.xlu2 %838 }
  0x8f   :  { %v2132_v23 = vpop.permute.xlu1 %350 }
  0x90   :  { %1348 = vmatmul.msk.bf16.gmra.mxu0 %vm483_vm0, %v1439_v13 }
  0x92   :  { %873 = vperm.xlu0 %1479, %v758_v24  }
  0x94   :  { %v2147_v31 = vpop.permute.xlu0 %340  ;;  %863 = vperm.xlu2 %1481, %v756_v34  }
  0x95   :  { %858 = vperm.xlu1 %1480, %v755_v8  }
  0x96   :  { %v2149_v32 = vpop.permute.xlu2 %305 }
  0x97   :  { %v2151_v33 = vpop.permute.xlu1 %345  ;;  %1067 = vmatmul.bf16.gmra.mxu3 %v1460_v15  ;;  %v1442_v15 = vld [vmem:[%s2417_s1 + $0x48] sm:$0xff] }
  0x9a   :  { %848 = vperm.xlu0 %1479, %v753_v39  }
  0x9c   :  { %v2162_v59 = vpop.permute.xlu0 %335  ;;  %662 = vperm.xlu2 %1481, %v659_v46  }
  0x9d   :  { %853 = vperm.xlu1 %1480, %v754_v35  }
  0x9e   :  { %v2173_v28 = vpop.permute.xlu2 %290 }
  0x9f   :  { %v2167_v41 = vpop.permute.xlu1 %320 }
  0xa0   :  { %1349 = vmatmul.msk.bf16.gmra.mxu0 %vm483_vm0, %v1440_v9 }
  0xa2   :  { %1132 = vperm.xlu0 %1479, %v1128_v45  }
  0xa4   :  { %v2184_v54 = vpop.permute.xlu0 %310  ;;  %1199 = vperm.xlu2 %1481, %v1193_v43  }
  0xa5   :  { %1137 = vperm.xlu1 %1480, %v1129_v16  }
  0xa6   :  { %v824_v63 = vpop.permute.xlu2 %823 }
  0xa7   :  { %v2186_v25 = vpop.permute.xlu1 %315  ;;  %1072 = vmatmul.bf16.gmra.mxu3 %v1461_v50 }
  0xaa   :  { %v1033_v58 = vpop.f32.mrf.mxu3  ;;  %1204 = vperm.xlu0 %1479, %v1194_v56  }
  0xac   :  { %v844_v49 = vpop.permute.xlu0 %843  ;;  %1214 = vperm.xlu2 %1481, %v1196_v7  }
  0xad   :  { %1209 = vperm.xlu1 %1480, %v1195_v47   ;;  %v2203_v60 = vpop.f32.mrf.mxu0 }
  0xae   :  { %v588_v61 = vpop.f32.mrf.mxu1  ;;  %v286_v11 = vpop.permute.xlu2 %285 }
  0xaf   :  { %v2205_v17 = vpop.permute.xlu1 %300  ;;  %v589_v7 = vadd.f32 %v588_v61, %v2060_v53 }
  0xb0   :  { %1350 = vmatmul.msk.bf16.gmra.mxu0 %vm483_vm0, %v1441_v6 }
  0xb2   :  { %v1035_v2 = vpop.f32.mrf.mxu3 }
  0xb3   :  { %v1036_v3 = vadd.f32 %v1035_v2, %v824_v63 }
  0xb4   :  { %v829_v21 = vpop.permute.xlu0 %828 }
  0xb5   :  { %v2211_v55 = vpop.f32.mrf.mxu0  ;;  %v1093_v45 = vmax.f32 %v1036_v3, 0.0 }
  0xb6   :  { %v590_v27 = vpop.f32.mrf.mxu1  ;;  %v271_v35 = vpop.permute.xlu2 %270 }
  0xb7   :  { %v834_v13 = vpop.permute.xlu1 %833  ;;  %1077 = vmatmul.bf16.gmra.mxu3 %v983_v36  ;;  %v591_v2 = vadd.f32 %v590_v27, %v2125_v12 }
  0xba   :  { %v1038_v24 = vpop.f32.mrf.mxu3 }
  0xbb   :  { %v1039_v22 = vadd.f32 %v1038_v24, %v829_v21  ;;  %v633_v24 = vmax.f32 %v589_v7, 0.0 }
  0xbc   :  { %v2213_v8 = vpop.permute.xlu0 %295 }
  0xbd   :  { %v543_v39 = vpop.f32.mrf.mxu0  ;;  %v1094_v56 = vmax.f32 %v1039_v22, 0.0 }
  0xbe   :  { %v2218_v34 = vpop.f32.mrf.mxu1  ;;  %v2231_v36 = vpop.permute.xlu2 %803  ;;  %v544_v12 = vadd.f32 %v543_v39, %v271_v35 }
  0xbf   :  { %v819_v9 = vpop.permute.xlu1 %818  ;;  %2454 = vst [vmem:[#allocation5_spill] sm:$0xff] %v2231_v36 }
  0xc0   :  { %v1034_v46 = vadd.f32 %v1033_v58, %v819_v9  ;;  %1351 = vmatmul.msk.bf16.gmra.mxu0 %vm483_vm0, %v1442_v15 }
  0xc2   :  { %v1092_v16 = vmax.f32 %v1034_v46, 0.0  ;;  %v1040_v50 = vpop.f32.mrf.mxu3 }
  0xc3   :  { %v1041_v43 = vadd.f32 %v1040_v50, %v834_v13  ;;  %v634_v13 = vmax.f32 %v591_v2, 0.0 }
  0xc4   :  { %v2221_v47 = vpack.c.bf16 %v1093_v45, %v1092_v16  ;;  %v2223_v63 = vpop.permute.xlu0 %908 }
  0xc5   :  { %v1095_v38 = vmax.f32 %v1041_v43, 0.0  ;;  %v545_v6 = vpop.f32.mrf.mxu0  ;;  %v2238_v16 = vpack.c.bf16 %v634_v13, %v633_v24 }
  0xc6   :  { %2452 = vst [vmem:[#allocation3_spill] sm:$0xff] %v2221_v47  ;;  %v2225_v10 = vpop.f32.mrf.mxu1  ;;  %v261_v61 = vpop.permute.xlu2 %260 }
  0xc7   :  { %v2229_v3 = vpack.c.bf16 %v1095_v38, %v1094_v56  ;;  %v281_v58 = vpop.permute.xlu1 %280 }
  0xc9   :  { %2453 = vst [vmem:[#allocation4_spill] sm:$0xff] %v2229_v3 }
  0xca   :  { %v1043_v21 = vpop.f32.mrf.mxu3 }
  0xcb   :  { %v1044_v22 = vadd.f32 %v1043_v21, %v2130_v20  ;;  %v615_v20 = vmax.f32 %v544_v12, 0.0 }
  0xcc   :  { %v2234_v15 = vpop.permute.xlu0 %808 }
  0xcd   :  { %2455 = vst [vmem:[#allocation6_spill] sm:$0xff] %v2234_v15  ;;  %v548_v9 = vpop.f32.mrf.mxu0  ;;  %v1096_v27 = vmax.f32 %v1044_v22, 0.0 }
  0xce   :  { %v598_v45 = vpop.f32.mrf.mxu1  ;;  %v549_v43 = vadd.f32 %v548_v9, %v281_v58 }
  0xcf   :  { %v2236_v46 = vpop.permute.xlu1 %813 }
  0xd0   :  { %2456 = vst [vmem:[#allocation7_spill] sm:$0xff] %v2236_v46  ;;  %v617_v24 = vmax.f32 %v549_v43, 0.0 }
  0xd2   :  { %v1045_v53 = vpop.f32.mrf.mxu3 }
  0xd3   :  { %v1046_v50 = vadd.f32 %v1045_v53, %v844_v49  ;;  %v2248_v49 = vpop.permute.xlu2 %793  ;;  %v539_v53 = vadd.f32 %v2203_v60, %v261_v61 }
  0xd4   :  { %v276_v56 = vpop.permute.xlu0 %275  ;;  %2459 = vst [vmem:[#allocation10_spill] sm:$0xff] %v2248_v49 }
  0xd5   :  { %v1097_v38 = vmax.f32 %v1046_v50, 0.0  ;;  %v546_v7 = vadd.f32 %v545_v6, %v276_v56  ;;  %v550_v2 = vpop.f32.mrf.mxu0 }
  0xd6   :  { %v600_v36 = vpop.f32.mrf.mxu1  ;;  %v551_v21 = vadd.f32 %v550_v2, %v286_v11 }
  0xd7   :  { %v2240_v15 = vpack.c.bf16 %v1097_v38, %v1096_v27  ;;  %v616_v47 = vmax.f32 %v546_v7, 0.0  ;;  %v2242_v3 = vpop.permute.xlu1 %798  ;;  %v613_v38 = vmax.f32 %v539_v53, 0.0  ;;  %v601_v49 = vadd.f32 %v600_v36, %v2043_v57 }
  0xd8   :  { %2458 = vst [vmem:[#allocation9_spill] sm:$0xff] %v2242_v3  ;;  %v618_v13 = vmax.f32 %v551_v21, 0.0 }
  0xd9   :  { %2457 = vst [vmem:[#allocation8_spill] sm:$0xff] %v2240_v15  ;;  %v2244_v46 = vpack.c.bf16 %v616_v47, %v615_v20 }
  0xda   :  { %v2246_v39 = vpop.f32.mrf.mxu3  ;;  %v2250_v35 = vpack.c.bf16 %v618_v13, %v617_v24 }
  0xdb   :  { %v2261_v50 = vpop.permute.xlu2 %778 }
  0xdc   :  { %v2252_v6 = vpop.permute.xlu0 %898  ;;  %2460 = vst [vmem:[#allocation11_spill] sm:$0xff] %v2261_v50 }
  0xdd   :  { %v553_v58 = vpop.f32.mrf.mxu0 }
  0xde   :  { %v603_v22 = vpop.f32.mrf.mxu1  ;;  %v554_v47 = vadd.f32 %v553_v58, %v2173_v28 }
  0xdf   :  { %v2254_v11 = vpop.permute.xlu1 %903 }
  0xe0   :  { %v619_v21 = vmax.f32 %v554_v47, 0.0  ;;  %v604_v47 = vadd.f32 %v603_v22, %v2078_v51 }
  0xe2   :  { %v2256_v9 = vpop.f32.mrf.mxu3  ;;  %v639_v3 = vmax.f32 %v604_v47, 0.0 }
  0xe3   :  { %v2276_v53 = vpop.permute.xlu2 %883 }
  0xe4   :  { %v266_v12 = vpop.permute.xlu0 %265 }
  0xe5   :  { %v541_v27 = vadd.f32 %v2211_v55, %v266_v12  ;;  %v555_v56 = vpop.f32.mrf.mxu0 }
  0xe6   :  { %v605_v43 = vpop.f32.mrf.mxu1  ;;  %v556_v7 = vadd.f32 %v555_v56, %v2213_v8 }
  0xe7   :  { %v614_v2 = vmax.f32 %v541_v27, 0.0  ;;  %v2264_v20 = vpop.permute.xlu1 %788 }
  0xe8   :  { %2461 = vst [vmem:[#allocation12_spill] sm:$0xff] %v2264_v20  ;;  %v620_v24 = vmax.f32 %v556_v7, 0.0  ;;  %v599_v20 = vadd.f32 %v598_v45, %v2027_v48  ;;  %v596_v48 = vadd.f32 %v2225_v10, %v2112_v14 }
  0xe9   :  { %v2266_v13 = vpack.c.bf16 %v614_v2, %v613_v38  ;;  %v606_v38 = vadd.f32 %v605_v43, %v2093_v40  ;;  %v638_v43 = vmax.f32 %v601_v49, 0.0 }
  0xea   :  { %v1053_v60 = vpop.f32.mrf.mxu3  ;;  %v2268_v61 = vpack.c.bf16 %v620_v24, %v619_v21  ;;  %v637_v40 = vmax.f32 %v599_v20, 0.0 }
  0xec   :  { %v2270_v28 = vpop.permute.xlu0 %888  ;;  %v656_v36 = vpack.c.bf16 %v638_v43, %v637_v40 }
  0xed   :  { %v2272_v55 = vpop.f32.mrf.mxu0 }
  0xee   :  { %v608_v58 = vpop.f32.mrf.mxu1 }
  0xef   :  { %v2274_v12 = vpop.permute.xlu1 %893  ;;  %v609_v27 = vadd.f32 %v608_v58, %v2076_v62  ;;  %v640_v62 = vmax.f32 %v606_v38, 0.0 }
  0xf1   :  { %v641_v21 = vmax.f32 %v609_v27, 0.0  ;;  %v657_v27 = vpack.c.bf16 %v640_v62, %v639_v3 }
  0xf2   :  { %v1055_v8 = vpop.f32.mrf.mxu3 }
  0xf4   :  { %v2279_v56 = vpop.permute.xlu0 %783 }
  0xf5   :  { %2462 = vst [vmem:[#allocation13_spill] sm:$0xff] %v2279_v56  ;;  %v2283_v7 = vpop.f32.mrf.mxu0  ;;  %v869_v56 = vpop.permute.xlu2 %868 }
  0xf6   :  { %v610_v2 = vpop.f32.mrf.mxu1 }
  0xf7   :  { %v611_v24 = vadd.f32 %v610_v2, %v2088_v0  ;;  %v2286_v50 = vpop.permute.xlu1 %878  ;;  %v594_v0 = vadd.f32 %v2218_v34, %v2110_v37  ;;  %v636_v2 = vmax.f32 %v596_v48, 0.0 }
  0xf9   :  { %v642_v58 = vmax.f32 %v611_v24, 0.0  ;;  %v635_v38 = vmax.f32 %v594_v0, 0.0 }
  0xfa   :  { %v1058_v15 = vpop.f32.mrf.mxu3 }
  0xfb   :  { %v658_v51 = vpack.c.bf16 %v642_v58, %v641_v21  ;;  %v1059_v45 = vadd.f32 %v1058_v15, %v869_v56  ;;  %v655_v58 = vpack.c.bf16 %v636_v2, %v635_v38 }
  0xfc   :  { %v2290_v22 = vpop.permute.xlu0 %768 }
  0xfd   :  { %687 = vmatpush.bf16.msra.mxu2 %v658_v51  ;;  %v563_v29 = vpop.f32.mrf.mxu0  ;;  %v864_v21 = vpop.permute.xlu2 %863  ;;  %v1102_v3 = vmax.f32 %v1059_v45, 0.0 }
  0xfe   :  { %v1056_v49 = vadd.f32 %v1055_v8, %v864_v21 }
  0xff   :  { %v2296_v57 = vpop.permute.xlu1 %773 }
 0x100   :  { %v1101_v14 = vmax.f32 %v1056_v49, 0.0 }
 0x101   :  { %688 = vmatpush.bf16.msra.mxu2 %v657_v27 }
 0x102   :  { %v1060_v47 = vpop.f32.mrf.mxu3 }
 0x104   :  { %v874_v20 = vpop.permute.xlu0 %873 }
 0x105   :  { %689 = vmatpush.bf16.msra.mxu2 %v656_v36  ;;  %v1061_v24 = vadd.f32 %v1060_v47, %v874_v20  ;;  %v565_v62 = vpop.f32.mrf.mxu0 }
 0x107   :  { %v859_v37 = vpop.permute.xlu1 %858  ;;  %v1103_v34 = vmax.f32 %v1061_v24, 0.0 }
 0x108   :  { %v1054_v51 = vadd.f32 %v1053_v60, %v859_v37 }
 0x109   :  { %690 = vmatpush.bf16.msra.mxu2 %v655_v58  ;;  %v2298_v10 = vpack.c.bf16 %v1103_v34, %v1102_v3 }
 0x10a   :  { %v2300_v40 = vpop.f32.mrf.mxu3  ;;  %v1100_v15 = vmax.f32 %v1054_v51, 0.0  ;;  %v566_v51 = vadd.f32 %v565_v62, %v2186_v25 }
 0x10c   :  { %v2302_v56 = vpack.c.bf16 %v1101_v14, %v1100_v15  ;;  %v849_v43 = vpop.permute.xlu0 %848 }
 0x10d   :  { %691 = vmatpush.bf16.msra.mxu2 %v2238_v16  ;;  %v1049_v8 = vadd.f32 %v2246_v39, %v849_v43  ;;  %v568_v27 = vpop.f32.mrf.mxu0  ;;  %v643_v16 = vld [vmem:[%s2422_s2] sm:$0xf]  ;;  %v564_v43 = vadd.f32 %v563_v29, %v2184_v54 }
 0x10e   :  { %666 = vst [vmem:[#allocation1] ss:$4 sm:$0xff] %v643_v16  ;;  %v569_v24 = vadd.f32 %v568_v27, %v2167_v41 }
 0x10f   :  { %v854_v0 = vpop.permute.xlu1 %853  ;;  %v1098_v36 = vmax.f32 %v1049_v8, 0.0  ;;  %v623_v41 = vmax.f32 %v564_v43, 0.0 }
 0x110   :  { %v1051_v48 = vadd.f32 %v2256_v9, %v854_v0  ;;  %v625_v8 = vmax.f32 %v569_v24, 0.0 }
 0x112   :  { %v2307_v60 = vpop.f32.mrf.mxu3  ;;  %v1099_v45 = vmax.f32 %v1051_v48, 0.0 }
 0x114   :  { %v2309_v47 = vpack.c.bf16 %v1099_v45, %v1098_v36 }
 0x115   :  { %v570_v38 = vpop.f32.mrf.mxu0 }
 0x116   :  { %v571_v9 = vadd.f32 %v570_v38, %v2114_v4  ;;  %v624_v4 = vmax.f32 %v566_v51, 0.0 }
 0x118   :  { %v626_v14 = vmax.f32 %v571_v9, 0.0  ;;  %v649_v25 = vpack.c.bf16 %v624_v4, %v623_v41 }
 0x11a   :  { %v1068_v2 = vpop.f32.mrf.mxu3  ;;  %v650_v48 = vpack.c.bf16 %v626_v14, %v625_v8 }
 0x11d   :  { %v573_v21 = vpop.f32.mrf.mxu0 }
 0x11e   :  { %v574_v39 = vadd.f32 %v573_v21, %v2095_v1  ;;  %v561_v1 = vadd.f32 %v2283_v7, %v2149_v32 }
 0x120   :  { %v627_v58 = vmax.f32 %v574_v39, 0.0  ;;  %v622_v36 = vmax.f32 %v561_v1, 0.0 }
 0x122   :  { %v1070_v20 = vpop.f32.mrf.mxu3 }
 0x125   :  { %v575_v49 = vpop.f32.mrf.mxu0 }
 0x126   :  { %v576_v3 = vadd.f32 %v575_v49, %v2162_v59  ;;  %v559_v59 = vadd.f32 %v2272_v55, %v2205_v17 }
 0x128   :  { %v628_v37 = vmax.f32 %v576_v3, 0.0  ;;  %v621_v62 = vmax.f32 %v559_v59, 0.0  ;;  %v1069_v3 = vadd.f32 %v1068_v2, %v2270_v28  ;;  %v1066_v28 = vadd.f32 %v2307_v60, %v2276_v53  ;;  %v2466_v53 = vld [vmem:[#allocation3_spill] sm:$0xff]  ;;  %v663_v60 = vpop.permute.xlu2 %662 }
 0x12a   :  { %v1073_v34 = vpop.f32.mrf.mxu3  ;;  %v651_v15 = vpack.c.bf16 %v628_v37, %v627_v58  ;;  %v648_v29 = vpack.c.bf16 %v622_v36, %v621_v62  ;;  %v1106_v2 = vmax.f32 %v1069_v3, 0.0  ;;  %v1105_v51 = vmax.f32 %v1066_v28, 0.0 }
 0x12b   :  { %v1074_v39 = vadd.f32 %v1073_v34, %v2252_v6 }
 0x12c   :  { %673 = vmatpush.bf16.msrb.mxu1 %v651_v15  ;;  %v668_v15 = vld.sshfl [vmem:[#allocation1 + $0x8] sm:$0xff pattern:$0x73625140] }
 0x12d   :  { %v578_v0 = vpop.f32.mrf.mxu0 }
 0x130   :  { %674 = vmatpush.bf16.msrb.mxu1 %v650_v48 }
 0x132   :  { %v1075_v27 = vpop.f32.mrf.mxu3 }
 0x133   :  { %v1076_v21 = vadd.f32 %v1075_v27, %v2254_v11  ;;  %v579_v11 = vadd.f32 %v578_v0, %v2147_v31 }
 0x134   :  { %675 = vmatpush.bf16.msrb.mxu1 %v649_v25 }
 0x135   :  { %v580_v45 = vpop.f32.mrf.mxu0  ;;  %v1109_v24 = vmax.f32 %v1076_v21, 0.0  ;;  %v629_v31 = vmax.f32 %v579_v11, 0.0 }
 0x138   :  { %676 = vmatpush.bf16.msrb.mxu1 %v648_v29 }
 0x13a   :  { %v1078_v54 = vpop.f32.mrf.mxu3 }
 0x13b   :  { %v1079_v38 = vadd.f32 %v1078_v54, %v2223_v63  ;;  %v581_v63 = vadd.f32 %v580_v45, %v2151_v33  ;;  %v1064_v33 = vadd.f32 %v2300_v40, %v2286_v50 }
 0x13c   :  { %677 = vmatpush.bf16.msrb.mxu1 %v2268_v61 }
 0x13d   :  { %v583_v32 = vpop.f32.mrf.mxu0  ;;  %v1110_v7 = vmax.f32 %v1079_v38, 0.0  ;;  %v630_v6 = vmax.f32 %v581_v63, 0.0  ;;  %v2468_v63 = vld [vmem:[#allocation5_spill] sm:$0xff] }
 0x13e   :  { %v584_v16 = vadd.f32 %v583_v32, %v2132_v23  ;;  %v667_v23 = vld.sshfl [vmem:[#allocation1] sm:$0xff pattern:$0x73625140] }
 0x13f   :  { %v1127_v55 = vpack.c.bf16 %v1110_v7, %v1110_v7  ;;  %v652_v34 = vpack.c.bf16 %v630_v6, %v629_v31  ;;  %v2472_v6 = vld [vmem:[#allocation12_spill] sm:$0xff] }
 0x140   :  { %678 = vmatpush.bf16.msrb.mxu1 %v2250_v35  ;;  %v1071_v35 = vadd.f32 %v1070_v20, %v2274_v12  ;;  %v631_v58 = vmax.f32 %v584_v16, 0.0 }
 0x141   :  { %v1155_v9 = vsel %vm1153_vm1, %v1127_v55, 0  ;;  %v1462_v55 = vld [vmem:[%s2423_s4 + $0x4] sm:$0xf] }
 0x142   :  { %v1080_v17 = vpop.f32.mrf.mxu3  ;;  %v1107_v12 = vmax.f32 %v1071_v35, 0.0  ;;  %v2470_v35 = vld [vmem:[#allocation9_spill] sm:$0xff] }
 0x144   :  { %679 = vmatpush.bf16.msrb.mxu1 %v2244_v46  ;;  %v1108_v46 = vmax.f32 %v1074_v39, 0.0  ;;  %v1125_v14 = vpack.c.bf16 %v1107_v12, %v1106_v2  ;;  %v2473_v2 = vld [vmem:[#allocation13_spill] sm:$0xff] }
 0x145   :  { %v585_v49 = vpop.f32.mrf.mxu0 }
 0x146   :  { %v586_v61 = vadd.f32 %v585_v49, %v2080_v26  ;;  %v1126_v20 = vpack.c.bf16 %v1109_v24, %v1108_v46 }
 0x148   :  { %v632_v37 = vmax.f32 %v586_v61, 0.0  ;;  %680 = vmatpush.bf16.msrb.mxu1 %v2266_v13  ;;  %v1104_v13 = vmax.f32 %v1064_v33, 0.0 }
 0x14a   :  { %v653_v26 = vpack.c.bf16 %v632_v37, %v631_v58  ;;  %v1124_v50 = vpack.c.bf16 %v1105_v51, %v1104_v13  ;;  %v2471_v37 = vld [vmem:[#allocation10_spill] sm:$0xff] }
 0x14b   :  { %681 = vmatmul.bf16.vlgmr.msrb.gmra.mxu1 %v667_v23 }
 0x14c   :  { %1172 = vmatpush.bf16.msra.mxu1 %v1155_v9  ;;  %692 = vmatpush.bf16.msra.mxu2 %v653_v26  ;;  %v2469_v9 = vld [vmem:[#allocation7_spill] sm:$0xff] }
 0x150   :  { %1173 = vmatpush.bf16.msra.mxu1 %v1126_v20  ;;  %693 = vmatpush.bf16.msra.mxu2 %v652_v34  ;;  %v2474_v34 = vld [vmem:[#allocation11_spill] sm:$0xff] }
 0x153   :  { %1357 = vmatmul.msk.bf16.vlgmr.msra.gmra.mxu2 %vm670_vm2, %v668_v15 }
 0x154   :  { %999 = vmatpush.bf16.msrb.mxu2 %v1614_v19  ;;  %1174 = vmatpush.bf16.msra.mxu1 %v1125_v14  ;;  %v1448_v19 = vld [vmem:[%s2416_s3] sm:$0xff] }
 0x158   :  { %1000 = vmatpush.bf16.msrb.mxu2 %v1654_v30  ;;  %1175 = vmatpush.bf16.msra.mxu1 %v1124_v50  ;;  %v2463_v30 = vld [vmem:[#allocation2_spill] sm:$0xff] }
 0x15c   :  { %1001 = vmatpush.bf16.msrb.mxu2 %v1699_v44  ;;  %1176 = vmatpush.bf16.msra.mxu1 %v2298_v10  ;;  %v2464_v44 = vld [vmem:[#allocation8_spill] sm:$0xff]  ;;  %v1452_v10 = vld [vmem:[%s2416_s3 + $0x20] sm:$0xff] }
 0x160   :  { %1002 = vmatpush.bf16.msrb.mxu2 %v1710_v52  ;;  %1177 = vmatpush.bf16.msra.mxu1 %v2302_v56  ;;  %v2465_v52 = vld [vmem:[#allocation4_spill] sm:$0xff] }
 0x164   :  { %1003 = vmatpush.bf16.msrb.mxu2 %v1611_v18  ;;  %1178 = vmatpush.bf16.msra.mxu1 %v2309_v47  ;;  %v1449_v18 = vld [vmem:[%s2416_s3 + $0x8] sm:$0xff] }
 0x168   :  { %1004 = vmatpush.bf16.msrb.mxu2 %v1695_v42  ;;  %v1450_v42 = vld [vmem:[%s2416_s3 + $0x10] sm:$0xff] }
 0x16c   :  { %1005 = vmatpush.bf16.msrb.mxu2 %v1830_v5  ;;  %v1451_v5 = vld [vmem:[%s2416_s3 + $0x18] sm:$0xff] }
 0x170   :  { %1006 = vmatpush.bf16.msrb.mxu2 %v2463_v30  ;;  %v1416_v30 = vld [vmem:[%s2423_s4] sm:$0xf] }
 0x173   :  { %1007 = vmatmul.bf16.vlgmr.msrb.gmra.mxu2 %v1448_v19 }
 0x174   :  { %1157 = vmatpush.bf16.msra.mxu2 %v2464_v44  ;;  %v1463_v44 = vld [vmem:[%s2423_s4 + $0x4] sm:$0xf0] }
 0x178   :  { %1158 = vmatpush.bf16.msra.mxu2 %v2465_v52  ;;  %v1417_v52 = vor.u32 %v1463_v44, %v1416_v30 }
 0x17c   :  { %1159 = vmatpush.bf16.msra.mxu2 %v2466_v53 }
 0x183   :  { %1012 = vmatmul.bf16.gmra.mxu2 %v1449_v18 }
 0x193   :  { %1017 = vmatmul.bf16.gmra.mxu2 %v1450_v42  ;;  %v1133_v42 = vpop.permute.xlu0 %1132 }
 0x1a3   :  { %1022 = vmatmul.bf16.gmra.mxu2 %v1451_v5 }
 0x1b3   :  { %1027 = vmatmul.bf16.gmra.mxu2 %v1452_v10  ;;  %v1138_v10 = vpop.permute.xlu1 %1137 }
 0x1c8   :  { %v682_v40 = vpop.f32.mrf.mxu1 }
 0x1c9   :  { %v683_v47 = vadd.f32 %v682_v40, %v663_v60 }
 0x1d0   :  { %v684_v56 = vpop.f32.mrf.mxu1 }
 0x1d6   :  { %v695_v43 = vpop.f32.mrf.mxu2 }
 0x1d7   :  { %v696_v8 = vadd.f32 %v695_v43, %v683_v47 }
 0x1d9   :  { %v699_v0 = vmax.f32 %v696_v8, 0.0 }
 0x1db   :  { %v1192_v1 = vpack.c.bf16 %v699_v0, %v699_v0 }
 0x1dd   :  { %v1236_v4 = vsel %vm1234_vm3, %v1192_v1, 0 }
 0x1de   :  { %1244 = vmatpush.bf16.msrb.mxu1 %v1236_v4  ;;  %v697_v48 = vpop.f32.mrf.mxu2  ;;  %v1464_v4 = vld [vmem:[%s2424_s5] sm:$0xff] }
 0x1df   :  { %v1465_v48 = vld [vmem:[%s2424_s5 + $0x8] sm:$0xff] }
 0x1f6   :  { %v1008_v59 = vpop.f32.mrf.mxu2 }
 0x1f7   :  { %v1009_v41 = vadd.f32 %v1008_v59, %v2290_v22  ;;  %v1418_v22 = vld [vmem:[%s2423_s4 + $0x8] sm:$0xf0]  ;;  %v1200_v59 = vpop.permute.xlu2 %1199 }
 0x1f8   :  { %v1421_v16 = vor.u32 %v1462_v55, %v1418_v22 }
 0x1f9   :  { %v1082_v25 = vmax.f32 %v1009_v41, 0.0 }
 0x1fa   :  { %1422 = vmatmul.msk.bf16.vlgmr.msra.gmra.mxu1 %vm1149_vm4, %v1421_v16 }
 0x1fe   :  { %v1010_v27 = vpop.f32.mrf.mxu2 }
 0x1ff   :  { %v1011_v36 = vadd.f32 %v1010_v27, %v2296_v57  ;;  %v2467_v57 = vld [vmem:[#allocation6_spill] sm:$0xff] }
 0x201   :  { %v1083_v62 = vmax.f32 %v1011_v36, 0.0 }
 0x203   :  { %v1113_v45 = vpack.c.bf16 %v1083_v62, %v1082_v25  ;;  %v1205_v25 = vpop.permute.xlu0 %1204 }
 0x206   :  { %v1013_v29 = vpop.f32.mrf.mxu2 }
 0x207   :  { %v1014_v13 = vadd.f32 %v1013_v29, %v2474_v34 }
 0x209   :  { %v1084_v50 = vmax.f32 %v1014_v13, 0.0 }
 0x20e   :  { %v1015_v54 = vpop.f32.mrf.mxu2 }
 0x20f   :  { %v1016_v12 = vadd.f32 %v1015_v54, %v2473_v2  ;;  %v1210_v54 = vpop.permute.xlu1 %1209 }
 0x211   :  { %v1085_v14 = vmax.f32 %v1016_v12, 0.0 }
 0x213   :  { %v1114_v19 = vpack.c.bf16 %v1085_v14, %v1084_v50 }
 0x216   :  { %v1018_v38 = vpop.f32.mrf.mxu2 }
 0x217   :  { %v1019_v26 = vadd.f32 %v1018_v38, %v2472_v6 }
 0x219   :  { %v1086_v51 = vmax.f32 %v1019_v26, 0.0 }
 0x21e   :  { %v1020_v32 = vpop.f32.mrf.mxu2 }
 0x21f   :  { %v1021_v23 = vadd.f32 %v1020_v32, %v2471_v37 }
 0x221   :  { %v1087_v20 = vmax.f32 %v1021_v23, 0.0 }
 0x223   :  { %v1115_v15 = vpack.c.bf16 %v1087_v20, %v1086_v51 }
 0x226   :  { %v1023_v7 = vpop.f32.mrf.mxu2 }
 0x227   :  { %v1024_v24 = vadd.f32 %v1023_v7, %v2470_v35 }
 0x229   :  { %v1088_v28 = vmax.f32 %v1024_v24, 0.0 }
 0x22e   :  { %v1025_v17 = vpop.f32.mrf.mxu2 }
 0x22f   :  { %v1026_v61 = vadd.f32 %v1025_v17, %v2468_v63  ;;  %v1215_v17 = vpop.permute.xlu2 %1214 }
 0x231   :  { %v1089_v46 = vmax.f32 %v1026_v61, 0.0 }
 0x233   :  { %v1116_v31 = vpack.c.bf16 %v1089_v46, %v1088_v28 }
 0x236   :  { %v1028_v21 = vpop.f32.mrf.mxu2 }
 0x237   :  { %v1029_v39 = vadd.f32 %v1028_v21, %v2467_v57 }
 0x239   :  { %v1090_v11 = vmax.f32 %v1029_v39, 0.0 }
 0x23e   :  { %v1030_v49 = vpop.f32.mrf.mxu2 }
 0x23f   :  { %v1031_v3 = vadd.f32 %v1030_v49, %v2469_v9 }
 0x241   :  { %v1091_v58 = vmax.f32 %v1031_v3, 0.0 }
 0x243   :  { %v1117_v33 = vpack.c.bf16 %v1091_v58, %v1090_v11 }
 0x245   :  { %1160 = vmatpush.bf16.msra.mxu2 %v1117_v33 }
 0x249   :  { %1161 = vmatpush.bf16.msra.mxu2 %v1116_v31 }
 0x24d   :  { %1162 = vmatpush.bf16.msra.mxu2 %v1115_v15 }
 0x251   :  { %1163 = vmatpush.bf16.msra.mxu2 %v1114_v19 }
 0x255   :  { %1164 = vmatpush.bf16.msra.mxu2 %v1113_v45 }
 0x258   :  { %1165 = vmatmul.bf16.vlgmr.msra.gmra.mxu2 %v1417_v52 }
 0x277   :  { %v1180_v18 = vpop.f32.mrf.mxu1 }
 0x27f   :  { %v1182_v47 = vpop.f32.mrf.mxu1 }
 0x2db   :  { %v1166_v53 = vpop.f32.mrf.mxu2 }
 0x2dc   :  { %v1167_v5 = vadd.f32 %v1166_v53, %v1133_v42 }
 0x2de   :  { %v1181_v56 = vadd.f32 %v1180_v18, %v1167_v5 }
 0x2e0   :  { %v1185_v8 = vmax.f32 %v1181_v56, 0.0 }
 0x2e3   :  { %v1168_v40 = vpop.f32.mrf.mxu2 }
 0x2e4   :  { %v1169_v60 = vadd.f32 %v1168_v40, %v1138_v10 }
 0x2e6   :  { %v1183_v43 = vadd.f32 %v1182_v47, %v1169_v60 }
 0x2e8   :  { %v1186_v0 = vmax.f32 %v1183_v43, 0.0 }
 0x2ea   :  { %v1191_v1 = vpack.c.bf16 %v1186_v0, %v1185_v8 }
 0x2ec   :  { %1245 = vmatpush.bf16.msrb.mxu1 %v1191_v1 }
 0x2ef   :  { %1431 = vmatmul.msk.bf16.vlgmr.msrb.gmra.mxu1 %vm1227_vm5, %v1464_v4 }
 0x2ff   :  { %1432 = vmatmul.msk.bf16.gmra.mxu1 %vm1227_vm5, %v1465_v48 }
 0x36c   :  { %v1247_v41 = vpop.f32.mrf.mxu1 }
 0x36d   :  { %v1248_v27 = vadd.f32 %v1247_v41, %v1200_v59 }
 0x36f   :  { %v1257_v36 = vmax.f32 %v1248_v27, 0.0 }
 0x371   :  { %1262 = vst.msk [vmem:[%s2425_s11] sm:$0xff] %vm1261_vm6, %v1257_v36 }
 0x374   :  { %v1249_v62 = vpop.f32.mrf.mxu1 }
 0x375   :  { %v1250_v45 = vadd.f32 %v1249_v62, %v1205_v25 }
 0x377   :  { %v1258_v29 = vmax.f32 %v1250_v45, 0.0 }
 0x379   :  { %1263 = vst.msk [vmem:[%s2425_s11 + $0x8] sm:$0xff] %vm1261_vm6, %v1258_v29 }
 0x37c   :  { %v1252_v38 = vpop.f32.mrf.mxu1 }
 0x37d   :  { %v1253_v32 = vadd.f32 %v1252_v38, %v1210_v54 }
 0x37f   :  { %v1259_v7 = vmax.f32 %v1253_v32, 0.0 }
 0x381   :  { %1264 = vst.msk [vmem:[%s2425_s11 + $0x10] sm:$0xff] %vm1261_vm6, %v1259_v7 }
 0x384   :  { %v1254_v55 = vpop.f32.mrf.mxu1 }
 0x385   :  { %v1255_v21 = vadd.f32 %v1254_v55, %v1215_v17 }
 0x387   :  { %v1260_v22 = vmax.f32 %v1255_v21, 0.0 }
 0x389   :  { %1265 = vst.msk [vmem:[%s2425_s11 + $0x18] sm:$0xff] %vm1261_vm6, %v1260_v22 }

</bundles_post_ra>
